<compile_context>
chip_gen: v7x
topology: tpu7x:2x2x1
jax: 0.10.0
libtpu: 0.0.40
codegen_flags: <defaults>
</compile_context>

<pallas_src>
import numpy as np
import jax
import jax.numpy as jnp
from jax import lax
from jax.experimental import pallas as pl
from jax.experimental.pallas import tpu as pltpu

_LANE = 128          # every channel dimension is zero-padded to a full 128-lane row
_NODE_TILE = 8       # sublane-dense node / graph tiles

# Flip to True on v6e/v7x for ~2x MXU rate (bf16 operands, f32 accumulate); re-check
# the allclose tolerance against the f32 reference if enabled.
_USE_BF16_MXU = False


def _round_up(x, m):
    return ((x + m - 1) // m) * m


def _mxu(x):
    return x.astype(jnp.bfloat16) if _USE_BF16_MXU else x


# ---------------------------------------------------------------------------
# Host-side (numpy) graph metadata: per-edge-tile node-tile range and CSR-style
# chunk starts for the segment-bounded scatter-max.
# ---------------------------------------------------------------------------
def _build_edge_tiles(dst_sorted_np, te, e_pad):
    e = int(dst_sorted_np.shape[0])
    num_tiles = e_pad // te
    tile_lo = np.zeros(num_tiles, np.int32)
    tile_hi = np.zeros(num_tiles, np.int32)
    spans = np.zeros(num_tiles, np.int32)
    starts = []
    max_seg = 1
    for k in range(num_tiles):
        s0, s1 = k * te, min((k + 1) * te, e)
        seg = dst_sorted_np[s0:s1]
        if seg.size == 0:
            tile_lo[k], tile_hi[k] = 0, -1
            starts.append(np.zeros(0, np.int64))
            continue
        nt = seg // _NODE_TILE
        lo, hi = int(nt[0]), int(nt[-1])           # real edges only (no sentinel)
        tile_lo[k], tile_hi[k] = lo, hi
        spans[k] = hi - lo + 1
        b = np.searchsorted(nt, np.arange(lo, hi + 2))   # boundaries, len span+1
        max_seg = max(max_seg, int((b[1:] - b[:-1]).max()))
        starts.append(b[:-1])
    max_span = max(1, int(spans.max()))
    # 8-aligned chunk length that always covers one node-tile segment.
    max_chunk = min(te, _round_up(max_seg + _NODE_TILE - 1, _NODE_TILE))
    chunk_start = np.zeros((num_tiles, max_span), np.int32)
    for k in range(num_tiles):
        b = starts[k]
        for s in range(int(spans[k])):
            aligned = (int(b[s]) // _NODE_TILE) * _NODE_TILE
            chunk_start[k, s] = min(aligned, te - max_chunk)
    return tile_lo, tile_hi, chunk_start.reshape(-1), max_span, max_chunk


def _build_node_tiles(batch_np, n_pad):
    n = int(batch_np.shape[0])
    num_tiles = n_pad // _NODE_TILE
    gtlo = np.zeros(num_tiles, np.int32)
    gthi = np.zeros(num_tiles, np.int32)
    for t in range(num_tiles):
        s0, s1 = t * _NODE_TILE, min((t + 1) * _NODE_TILE, n)
        seg = batch_np[s0:s1]
        if seg.size == 0:
            gtlo[t], gthi[t] = 0, -1
            continue
        gtlo[t] = int(seg.min()) // _NODE_TILE
        gthi[t] = int(seg.max()) // _NODE_TILE
    max_gtspan = max(1, int((gthi - gtlo).max()) + 1)
    return gtlo, gthi, max_gtspan


# ---------------------------------------------------------------------------
# Kernel 1 (fused): PointNetLayer (per-edge MLP + segment-bounded scatter-max)
#                   + BatchNorm1d (training-mode batch stats) + ReLU.
# Grid: edge tiles (reduction axis).  Output (n_pad, 128) is a VMEM-resident
# accumulator; BN+ReLU epilogue runs on the last grid step.
# ---------------------------------------------------------------------------
def pointnet_layer_bn_relu(feat_a, feat_rel, dst2d, tile_lo, tile_hi, chunk_start,
                           w1a, w1r, b1, w2, b2, gamma, beta,
                           n_real, n_pad, max_span, max_chunk):
    e_pad, ca = feat_a.shape
    cr = feat_rel.shape[1]
    num_tiles = int(tile_lo.shape[0])
    te = e_pad // num_tiles
    lane = w2.shape[1]

    def kernel(lo_ref, hi_ref, cs_ref, fa_ref, fr_ref, dst_ref,
               w1a_ref, w1r_ref, b1_ref, w2_ref, b2_ref, g_ref, bt_ref,
               out_ref, msg_scr):
        k = pl.program_id(0)

        # Accumulator init (-inf; empty-node fixup deferred to the epilogue).
        @pl.when(k == 0)
        def _init():
            out_ref[...] = jnp.full_like(out_ref, -jnp.inf)

        # Per-edge MLP on the MXU; result staged to VMEM scratch (keeps the vreg
        # file free for the scatter loop and enables large edge tiles).
        h = (jnp.dot(_mxu(fa_ref[...]), _mxu(w1a_ref[...]),
                     preferred_element_type=jnp.float32)
             + jnp.dot(_mxu(fr_ref[...]), _mxu(w1r_ref[...]),
                       preferred_element_type=jnp.float32)
             + b1_ref[...])
        h = jnp.maximum(h, 0.0)
        msg_scr[...] = (jnp.dot(_mxu(h), _mxu(w2_ref[...]),
                                preferred_element_type=jnp.float32) + b2_ref[...])

        lo = lo_ref[k]     # first node tile touched by this edge tile (real edges)
        hi = hi_ref[k]     # last  node tile touched by this edge tile (real edges)

        # Segment-bounded scatter-max: for each touched node tile, only the
        # 8-aligned max_chunk slice containing its sorted edge segment is read.
        def tile_body(s, carry):
            t = lo + s

            @pl.when(t <= hi)
            def _():
                nb = pl.multiple_of(t * _NODE_TILE, _NODE_TILE)
                start = pl.multiple_of(cs_ref[k * max_span + s], _NODE_TILE)
                msg_c = msg_scr[pl.ds(start, max_chunk), :]          # (chunk, 128)
                local = dst_ref[pl.ds(start, max_chunk), :] - nb     # (chunk, 1)
                rows = []
                for j in range(_NODE_TILE):
                    sel = jnp.where(local == j, msg_c, -jnp.inf)
                    rows.append(jnp.max(sel, axis=0, keepdims=True))
                new8 = jnp.concatenate(rows, axis=0)                 # (8, 128)
                cur = out_ref[pl.ds(nb, _NODE_TILE), :]
                out_ref[pl.ds(nb, _NODE_TILE), :] = jnp.maximum(cur, new8)
            return carry

        lax.fori_loop(0, max_span, tile_body, 0)

        # Epilogue on the last edge tile: empty-node fixup + fused BN + ReLU.
        @pl.when(k == num_tiles - 1)
        def _epilogue():
            x = out_ref[...]
            x = jnp.where(x == -jnp.inf, 0.0, x)          # PyG max-aggr default 0
            row = lax.broadcasted_iota(jnp.int32, x.shape, 0)
            valid = row < n_real                          # mask padded node rows
            x = jnp.where(valid, x, 0.0)
            inv_n = 1.0 / float(n_real)
            mean = jnp.sum(x, axis=0, keepdims=True) * inv_n
            d = jnp.where(valid, x - mean, 0.0)
            var = jnp.sum(d * d, axis=0, keepdims=True) * inv_n   # biased (PyTorch)
            y = (x - mean) * lax.rsqrt(var + 1e-5) * g_ref[...] + bt_ref[...]
            y = jnp.maximum(y, 0.0)
            out_ref[...] = jnp.where(valid, y, 0.0)

    grid_spec = pltpu.PrefetchScalarGridSpec(
        num_scalar_prefetch=3,
        grid=(num_tiles,),
        in_specs=[
            pl.BlockSpec((te, ca), lambda k, lo, hi, cs: (k, 0)),     # node feats @src
            pl.BlockSpec((te, cr), lambda k, lo, hi, cs: (k, 0)),     # rel positions
            pl.BlockSpec((te, 1), lambda k, lo, hi, cs: (k, 0)),      # sorted dst
            pl.BlockSpec(w1a.shape, lambda k, lo, hi, cs: (0, 0)),
            pl.BlockSpec(w1r.shape, lambda k, lo, hi, cs: (0, 0)),
            pl.BlockSpec(b1.shape, lambda k, lo, hi, cs: (0, 0)),
            pl.BlockSpec(w2.shape, lambda k, lo, hi, cs: (0, 0)),
            pl.BlockSpec(b2.shape, lambda k, lo, hi, cs: (0, 0)),
            pl.BlockSpec(gamma.shape, lambda k, lo, hi, cs: (0, 0)),
            pl.BlockSpec(beta.shape, lambda k, lo, hi, cs: (0, 0)),
        ],
        out_specs=pl.BlockSpec((n_pad, lane), lambda k, lo, hi, cs: (0, 0)),
        scratch_shapes=[pltpu.VMEM((te, lane), jnp.float32)],         # staged msg
    )

    in_bytes = 4 * (te * ca + te * cr + te
                    + w1a.size + w1r.size + b1.size + w2.size + b2.size
                    + gamma.size + beta.size)
    vmem_bytes = 4 * (n_pad * lane + te * lane) + 3 * in_bytes + (4 << 20)
    vmem_bytes = int(min(max(vmem_bytes, 32 << 20), 64 << 20))  # 64 MiB v7x ceiling

    return pl.pallas_call(
        kernel,
        out_shape=jax.ShapeDtypeStruct((n_pad, lane), jnp.float32),
        grid_spec=grid_spec,
        compiler_params=pltpu.CompilerParams(
            dimension_semantics=("arbitrary",),       # edge axis is a reduction
            vmem_limit_bytes=vmem_bytes),
    )(tile_lo, tile_hi, chunk_start, feat_a, feat_rel, dst2d,
      w1a, w1r, b1, w2, b2, gamma, beta)


# ---------------------------------------------------------------------------
# Kernel 2: global_max_pool over batch segments + classifier Linear.
# Grid over 8-row node tiles; pooled (g_pad, 128) accumulator in VMEM scratch;
# classifier matmul fused into the last grid step.
# ---------------------------------------------------------------------------
def pool_classifier(h, batch2d, gtlo, gthi, w, b, num_graphs, max_gtspan):
    n_pad, lane = h.shape
    lane_out = w.shape[1]
    g_pad = _round_up(max(num_graphs, _NODE_TILE), _NODE_TILE)
    num_tiles = n_pad // _NODE_TILE

    def kernel(gtlo_ref, gthi_ref, h_ref, bt_ref, w_ref, b_ref, out_ref, pooled):
        k = pl.program_id(0)

        @pl.when(k == 0)
        def _init():
            pooled[...] = jnp.full_like(pooled, -jnp.inf)

        hx = h_ref[...]                 # (8, 128) node tile
        bt = bt_ref[...]                # (8, 1) graph ids (sentinel for padding)
        lo = gtlo_ref[k]
        hi = gthi_ref[k]

        def gt_body(s, carry):
            gt = lo + s

            @pl.when(gt <= hi)
            def _():
                gb = pl.multiple_of(gt * _NODE_TILE, _NODE_TILE)
                local = bt - gb
                rows = []
                for j in range(_NODE_TILE):
                    sel = jnp.where(local == j, hx, -jnp.inf)
                    rows.append(jnp.max(sel, axis=0, keepdims=True))
                new8 = jnp.concatenate(rows, axis=0)
                cur = pooled[pl.ds(gb, _NODE_TILE), :]
                pooled[pl.ds(gb, _NODE_TILE), :] = jnp.maximum(cur, new8)
            return carry

        lax.fori_loop(0, max_gtspan, gt_body, 0)

        @pl.when(k == num_tiles - 1)
        def _epilogue():
            p = pooled[...]
            p = jnp.where(p == -jnp.inf, 0.0, p)        # empty / padded graphs
            out_ref[...] = jnp.dot(p, w_ref[...],
                                   preferred_element_type=jnp.float32) + b_ref[...]

    grid_spec = pltpu.PrefetchScalarGridSpec(
        num_scalar_prefetch=2,
        grid=(num_tiles,),
        in_specs=[
            pl.BlockSpec((_NODE_TILE, lane), lambda k, lo, hi: (k, 0)),
            pl.BlockSpec((_NODE_TILE, 1), lambda k, lo, hi: (k, 0)),
            pl.BlockSpec(w.shape, lambda k, lo, hi: (0, 0)),
            pl.BlockSpec(b.shape, lambda k, lo, hi: (0, 0)),
        ],
        out_specs=pl.BlockSpec((g_pad, lane_out), lambda k, lo, hi: (0, 0)),
        scratch_shapes=[pltpu.VMEM((g_pad, lane), jnp.float32)],
    )

    vmem_bytes = 4 * (g_pad * lane_out + g_pad * lane
                      + 3 * (_NODE_TILE * lane + _NODE_TILE + w.size + b.size))
    vmem_bytes = int(min(max(vmem_bytes + (4 << 20), 32 << 20), 64 << 20))

    return pl.pallas_call(
        kernel,
        out_shape=jax.ShapeDtypeStruct((g_pad, lane_out), jnp.float32),
        grid_spec=grid_spec,
        compiler_params=pltpu.CompilerParams(
            dimension_semantics=("arbitrary",),
            vmem_limit_bytes=vmem_bytes),
    )(gtlo, gthi, h, batch2d, w, b)


# ---------------------------------------------------------------------------
# Full forward pass (host-side glue: numpy edge sort / CSR metadata, gathers)
# ---------------------------------------------------------------------------
def pointnet_forward(params, pos, edge_index, batch, num_graphs):
    hidden_dim = params["c1_w2"].shape[1]
    num_classes = params["cls_w"].shape[1]
    n = int(pos.shape[0])
    n_pad = _round_up(max(n, _NODE_TILE), _NODE_TILE)

    # Graph-structure metadata entirely on the host (numpy): no device syncs from
    # int(jnp.max(...)) and no recompiles from padded-sentinel-inflated spans.
    ei_np = np.asarray(edge_index).astype(np.int32)
    batch_np = np.asarray(batch).astype(np.int32)
    src_np, dst_np = ei_np[0], ei_np[1]
    e = int(src_np.shape[0])
    order = np.argsort(dst_np, kind="stable")          # sort edges by destination
    src_np, dst_np = src_np[order], dst_np[order]

    # Edge-tile size.  With the segment-bounded scatter, bigger tiles are ~free:
    # tune 512-1024 on v5e/v7x, 1024-2048 on v6e (vmem_limit_bytes is set above).
    te = min(1024, _round_up(e, _NODE_TILE))
    e_pad = _round_up(e, te)

    tile_lo, tile_hi, chunk_start, max_span, max_chunk = _build_edge_tiles(
        dst_np, te, e_pad)

    # Padded edges get a sentinel destination (n_pad) that never matches a node.
    dst_dev = jnp.asarray(
        np.concatenate([dst_np, np.full(e_pad - e, n_pad, np.int32)])
        .astype(np.int32).reshape(-1, 1))
    lo_dev = jnp.asarray(tile_lo)
    hi_dev = jnp.asarray(tile_hi)
    cs_dev = jnp.asarray(chunk_start)
    src_idx = jnp.asarray(src_np)
    dst_idx = jnp.asarray(dst_np)

    def pad2(x, rows, cols):
        return jnp.pad(x, ((0, rows - x.shape[0]), (0, cols - x.shape[1])))

    pos_src = pos[src_idx]
    rel_p = pad2(pos_src - pos[dst_idx], e_pad, _NODE_TILE)   # (e_pad, 8), reused
    feat_a1 = pad2(pos_src, e_pad, _NODE_TILE)                # (e_pad, 8)

    # ---- conv1 + bn1 + relu (fused kernel); W1 split into [node | rel] parts ----
    h1 = pointnet_layer_bn_relu(
        feat_a1, rel_p, dst_dev, lo_dev, hi_dev, cs_dev,
        pad2(params["c1_w1"][:3], _NODE_TILE, _LANE),
        pad2(params["c1_w1"][3:], _NODE_TILE, _LANE),
        pad2(params["c1_b1"], 1, _LANE),
        pad2(params["c1_w2"], _LANE, _LANE), pad2(params["c1_b2"], 1, _LANE),
        pad2(params["bn1_g"], 1, _LANE), pad2(params["bn1_b"], 1, _LANE),
        n, n_pad, max_span, max_chunk)

    # ---- conv2 + bn2 + relu (fused kernel) ----
    # TODO(synk): do the h1[src] row gather in-kernel (h1 kept in HBM/ANY with src
    # scalar-prefetched) to remove this (E, 128) HBM round trip.
    feat_a2 = jnp.pad(h1[src_idx], ((0, e_pad - e), (0, 0)))   # (e_pad, 128)
    h2 = pointnet_layer_bn_relu(
        feat_a2, rel_p, dst_dev, lo_dev, hi_dev, cs_dev,
        pad2(params["c2_w1"][:hidden_dim], _LANE, _LANE),
        pad2(params["c2_w1"][hidden_dim:], _NODE_TILE, _LANE),
        pad2(params["c2_b1"], 1, _LANE),
        pad2(params["c2_w2"], _LANE, _LANE), pad2(params["c2_b2"], 1, _LANE),
        pad2(params["bn2_g"], 1, _LANE), pad2(params["bn2_b"], 1, _LANE),
        n, n_pad, max_span, max_chunk)

    # ---- global_max_pool + classifier (segment-bounded, node-tiled) ----
    gtlo, gthi, max_gtspan = _build_node_tiles(batch_np, n_pad)
    batch_dev = jnp.asarray(
        np.concatenate([batch_np, np.full(n_pad - n, num_graphs, np.int32)])
        .astype(np.int32).reshape(-1, 1))
    out = pool_classifier(h2, batch_dev, jnp.asarray(gtlo), jnp.asarray(gthi),
                          pad2(params["cls_w"], _LANE, _LANE),
                          pad2(params["cls_b"], 1, _LANE),
                          num_graphs, max_gtspan)
    return out[:num_graphs, :num_classes]


# ---------------------------------------------------------------------------
# Pure-JAX reference (for correctness check)
# ---------------------------------------------------------------------------
def reference_forward(params, pos, edge_index, batch, num_graphs):
    src, dst = edge_index[0], edge_index[1]
    n_nodes = pos.shape[0]
    rel = pos[src] - pos[dst]

    def layer(ef, w1, b1, w2, b2):
        m = jnp.maximum(ef @ w1 + b1, 0.0) @ w2 + b2
        agg = jax.ops.segment_max(m, dst, num_segments=n_nodes)
        return jnp.where(jnp.isfinite(agg), agg, 0.0)

    def bn_relu_ref(x, g, b):
        mean = x.mean(axis=0, keepdims=True)
        var = ((x - mean) ** 2).mean(axis=0, keepdims=True)
        return jnp.maximum((x - mean) / jnp.sqrt(var + 1e-5) * g + b, 0.0)

    h = layer(jnp.concatenate([pos[src], rel], -1),
              params["c1_w1"], params["c1_b1"], params["c1_w2"], params["c1_b2"])
    h = bn_relu_ref(h, params["bn1_g"], params["bn1_b"])
    h = layer(jnp.concatenate([h[src], rel], -1),
              params["c2_w1"], params["c2_b1"], params["c2_w2"], params["c2_b2"])
    h = bn_relu_ref(h, params["bn2_g"], params["bn2_b"])
    pooled = jax.ops.segment_max(h, batch, num_segments=num_graphs)
    return pooled @ params["cls_w"] + params["cls_b"]


# ---------------------------------------------------------------------------
# Deterministic parameter init (PyTorch-Linear-style uniform fan-in init)
# ---------------------------------------------------------------------------
def init_params(key, hidden_dim=32, num_classes=2):
    def lin(k, fan_in, fan_out):
        bound = 1.0 / float(fan_in) ** 0.5
        kw, kb = jax.random.split(k)
        w = jax.random.uniform(kw, (fan_in, fan_out), jnp.float32, -bound, bound)
        b = jax.random.uniform(kb, (1, fan_out), jnp.float32, -bound, bound)
        return w, b

    ks = jax.random.split(key, 5)
    p = {}
    p["c1_w1"], p["c1_b1"] = lin(ks[0], 3 + 3, hidden_dim)
    p["c1_w2"], p["c1_b2"] = lin(ks[1], hidden_dim, hidden_dim)
    p["c2_w1"], p["c2_b1"] = lin(ks[2], hidden_dim + 3, hidden_dim * 2)
    p["c2_w2"], p["c2_b2"] = lin(ks[3], hidden_dim * 2, hidden_dim * 2)
    p["cls_w"], p["cls_b"] = lin(ks[4], hidden_dim * 2, num_classes)
    p["bn1_g"] = jnp.ones((1, hidden_dim), jnp.float32)
    p["bn1_b"] = jnp.zeros((1, hidden_dim), jnp.float32)
    p["bn2_g"] = jnp.ones((1, hidden_dim * 2), jnp.float32)
    p["bn2_b"] = jnp.zeros((1, hidden_dim * 2), jnp.float32)
    return p


if __name__ == "__main__":
    hidden_dim, num_classes = 32, 2
    num_graphs, nodes_per_graph = 2, 8
    n_nodes = num_graphs * nodes_per_graph

    key = jax.random.PRNGKey(0)
    k_pos, k_par = jax.random.split(key)

    pos = jax.random.normal(k_pos, (n_nodes, 3), dtype=jnp.float32)

    # Small ring-style graph so every node has incoming edges (matches PyG
    # scatter-max semantics).
    edges = []
    for g in range(num_graphs):
        off = g * nodes_per_graph
        for i in range(nodes_per_graph):
            edges.append(((i + 1) % nodes_per_graph + off, i + off))  # (src j, dst i)
            edges.append(((i + 2) % nodes_per_graph + off, i + off))
    edge_index = jnp.array(edges, dtype=jnp.int32).T                  # (2, E), E = 32
    batch = jnp.array([g for g in range(num_graphs) for _ in range(nodes_per_graph)],
                      dtype=jnp.int32)

    params = init_params(k_par, hidden_dim, num_classes)

    out = pointnet_forward(params, pos, edge_index, batch, num_graphs)
    out = jax.block_until_ready(out)

    ref = reference_forward(params, pos, edge_index, batch, num_graphs)
    assert out.shape == (num_graphs, num_classes)
    assert jnp.allclose(out, ref, atol=1e-3, rtol=1e-3), (out, ref)

    print("KERNEL_OK")
</pallas_src>

<mosaic_0001>
module attributes {stable_mosaic.version = 11 : i64} {
  func.func @kernel(%arg0: i32, %arg1: memref<1xi32, #tpu.memory_space<smem>>, %arg2: memref<1xi32, #tpu.memory_space<smem>>, %arg3: memref<2xi32, #tpu.memory_space<smem>>, %arg4: memref<32x8xf32, #tpu.memory_space<vmem>>, %arg5: memref<32x8xf32, #tpu.memory_space<vmem>>, %arg6: memref<32x1xi32, #tpu.memory_space<vmem>>, %arg7: memref<8x128xf32, #tpu.memory_space<vmem>>, %arg8: memref<8x128xf32, #tpu.memory_space<vmem>>, %arg9: memref<1x128xf32, #tpu.memory_space<vmem>>, %arg10: memref<128x128xf32, #tpu.memory_space<vmem>>, %arg11: memref<1x128xf32, #tpu.memory_space<vmem>>, %arg12: memref<1x128xf32, #tpu.memory_space<vmem>>, %arg13: memref<1x128xf32, #tpu.memory_space<vmem>>, %arg14: memref<16x128xf32, #tpu.memory_space<vmem>>, %arg15: memref<32x128xf32, #tpu.memory_space<vmem>>) attributes {dimension_semantics = [#tpu.dimension_semantics<arbitrary>], iteration_bounds = array<i64: 1>, scalar_prefetch = 3 : i64, scratch_operands = 1 : i64, tpu.core_type = #tpu.core_type<tc>, window_params = [{transform_indices = @transform_0, window_bounds = array<i64: 32, 8>}, {transform_indices = @transform_1, window_bounds = array<i64: 32, 8>}, {transform_indices = @transform_2, window_bounds = array<i64: 32, 1>}, {pipeline_mode = #tpu.pipeline_mode<synchronous>, transform_indices = @transform_3, window_bounds = array<i64: 8, 128>}, {pipeline_mode = #tpu.pipeline_mode<synchronous>, transform_indices = @transform_4, window_bounds = array<i64: 8, 128>}, {pipeline_mode = #tpu.pipeline_mode<synchronous>, transform_indices = @transform_5, window_bounds = array<i64: 1, 128>}, {pipeline_mode = #tpu.pipeline_mode<synchronous>, transform_indices = @transform_6, window_bounds = array<i64: 128, 128>}, {pipeline_mode = #tpu.pipeline_mode<synchronous>, transform_indices = @transform_7, window_bounds = array<i64: 1, 128>}, {pipeline_mode = #tpu.pipeline_mode<synchronous>, transform_indices = @transform_8, window_bounds = array<i64: 1, 128>}, {pipeline_mode = #tpu.pipeline_mode<synchronous>, transform_indices = @transform_9, window_bounds = array<i64: 1, 128>}, {pipeline_mode = #tpu.pipeline_mode<synchronous>, transform_indices = @transform_10, window_bounds = array<i64: 16, 128>}]} {
    %c0_i32 = arith.constant 0 : i32
    %0 = arith.cmpi eq, %arg0, %c0_i32 : i32
    %1 = arith.extui %0 : i1 to i32
    %c0_i32_0 = arith.constant 0 : i32
    %2 = arith.cmpi ne, %1, %c0_i32_0 : i32
    scf.if %2 {
      %cst_23 = arith.constant 0xFF800000 : f32
      %29 = vector.broadcast %cst_23 : f32 to vector<16x128xf32>
      %c0_24 = arith.constant 0 : index
      %c0_25 = arith.constant 0 : index
      %30 = vector.load %arg14[%c0_24, %c0_25] : memref<16x128xf32, #tpu.memory_space<vmem>>, vector<16x128xf32>
      tpu.vector_store %arg14[%c0_24, %c0_25], %29 {strides = array<i32>} : memref<16x128xf32, #tpu.memory_space<vmem>>, vector<16x128xf32>,
    } else {
    }
    %c0 = arith.constant 0 : index
    %c0_1 = arith.constant 0 : index
    %3 = vector.load %arg4[%c0, %c0_1] : memref<32x8xf32, #tpu.memory_space<vmem>>, vector<32x8xf32>
    %c0_2 = arith.constant 0 : index
    %c0_3 = arith.constant 0 : index
    %4 = vector.load %arg7[%c0_2, %c0_3] : memref<8x128xf32, #tpu.memory_space<vmem>>, vector<8x128xf32>
    %cst = arith.constant dense<0.000000e+00> : vector<32x128xf32>
    %5 = tpu.matmul %3, %4, %cst {dimension_numbers = #tpu.dot_dimension_numbers<[1], [0], [0], [1], [0, 0, 1, 1], [], []>} : vector<32x8xf32>, vector<8x128xf32>, vector<32x128xf32> -> vector<32x128xf32>
    %c0_4 = arith.constant 0 : index
    %c0_5 = arith.constant 0 : index
    %6 = vector.load %arg5[%c0_4, %c0_5] : memref<32x8xf32, #tpu.memory_space<vmem>>, vector<32x8xf32>
    %c0_6 = arith.constant 0 : index
    %c0_7 = arith.constant 0 : index
    %7 = vector.load %arg8[%c0_6, %c0_7] : memref<8x128xf32, #tpu.memory_space<vmem>>, vector<8x128xf32>
    %cst_8 = arith.constant dense<0.000000e+00> : vector<32x128xf32>
    %8 = tpu.matmul %6, %7, %cst_8 {dimension_numbers = #tpu.dot_dimension_numbers<[1], [0], [0], [1], [0, 0, 1, 1], [], []>} : vector<32x8xf32>, vector<8x128xf32>, vector<32x128xf32> -> vector<32x128xf32>
    %9 = arith.addf %5, %8 : vector<32x128xf32>
    %c0_9 = arith.constant 0 : index
    %c0_10 = arith.constant 0 : index
    %10 = vector.load %arg9[%c0_9, %c0_10] : memref<1x128xf32, #tpu.memory_space<vmem>>, vector<1x128xf32>
    %11 = vector.broadcast %10 : vector<1x128xf32> to vector<32x128xf32>
    %12 = arith.addf %9, %11 : vector<32x128xf32>
    %cst_11 = arith.constant 0.000000e+00 : f32
    %13 = vector.broadcast %cst_11 : f32 to vector<32x128xf32>
    %14 = arith.maximumf %12, %13 : vector<32x128xf32>
    %c0_12 = arith.constant 0 : index
    %c0_13 = arith.constant 0 : index
    %15 = vector.load %arg10[%c0_12, %c0_13] : memref<128x128xf32, #tpu.memory_space<vmem>>, vector<128x128xf32>
    %cst_14 = arith.constant dense<0.000000e+00> : vector<32x128xf32>
    %16 = tpu.matmul %14, %15, %cst_14 {dimension_numbers = #tpu.dot_dimension_numbers<[1], [0], [0], [1], [0, 0, 1, 1], [], []>} : vector<32x128xf32>, vector<128x128xf32>, vector<32x128xf32> -> vector<32x128xf32>
    %c0_15 = arith.constant 0 : index
    %c0_16 = arith.constant 0 : index
    %17 = vector.load %arg11[%c0_15, %c0_16] : memref<1x128xf32, #tpu.memory_space<vmem>>, vector<1x128xf32>
    %18 = vector.broadcast %17 : vector<1x128xf32> to vector<32x128xf32>
    %19 = arith.addf %16, %18 : vector<32x128xf32>
    %c0_17 = arith.constant 0 : index
    %c0_18 = arith.constant 0 : index
    %20 = vector.load %arg15[%c0_17, %c0_18] : memref<32x128xf32, #tpu.memory_space<vmem>>, vector<32x128xf32>
    tpu.vector_store %arg15[%c0_17, %c0_18], %19 {strides = array<i32>} : memref<32x128xf32, #tpu.memory_space<vmem>>, vector<32x128xf32>,
    %21 = arith.index_cast %arg0 : i32 to index
    %22 = memref.load %arg1[%21] : memref<1xi32, #tpu.memory_space<smem>>
    %23 = arith.index_cast %arg0 : i32 to index
    %24 = memref.load %arg2[%23] : memref<1xi32, #tpu.memory_space<smem>>
    %c0_i32_19 = arith.constant 0 : i32
    %c2_i32 = arith.constant 2 : i32
    %25 = arith.addi %c0_i32_19, %c2_i32 : i32
    %c1_i32 = arith.constant 1 : i32
    scf.for %arg16 = %c0_i32_19 to %25 step %c1_i32  : i32 {
      %29 = arith.addi %22, %arg16 : i32
      %30 = arith.cmpi sle, %29, %24 : i32
      %31 = arith.extui %30 : i1 to i32
      %c0_i32_23 = arith.constant 0 : i32
      %32 = arith.cmpi ne, %31, %c0_i32_23 : i32
      scf.if %32 {
        %c8_i32 = arith.constant 8 : i32
        %33 = arith.muli %29, %c8_i32 : i32
        %34 = tpu.assume_multiple %33, 8 : i32
        %c2_i32_24 = arith.constant 2 : i32
        %35 = arith.muli %arg0, %c2_i32_24 : i32
        %36 = arith.addi %35, %arg16 : i32
        %37 = arith.index_cast %36 : i32 to index
        %38 = memref.load %arg3[%37] : memref<2xi32, #tpu.memory_space<smem>>
        %39 = tpu.assume_multiple %38, 8 : i32
        %40 = arith.index_cast %39 : i32 to index
        %c0_25 = arith.constant 0 : index
        %41 = vector.load %arg15[%40, %c0_25] : memref<32x128xf32, #tpu.memory_space<vmem>>, vector<24x128xf32>
        %42 = arith.index_cast %39 : i32 to index
        %c0_26 = arith.constant 0 : index
        %43 = vector.load %arg6[%42, %c0_26] : memref<32x1xi32, #tpu.memory_space<vmem>>, vector<24x1xi32>
        %44 = vector.broadcast %34 : i32 to vector<24x1xi32>
        %45 = arith.subi %43, %44 : vector<24x1xi32>
        %c0_i32_27 = arith.constant 0 : i32
        %46 = vector.broadcast %c0_i32_27 : i32 to vector<24x1xi32>
        %47 = arith.cmpi eq, %45, %46 : vector<24x1xi32>
        %cst_28 = arith.constant 0xFF800000 : f32
        %48 = vector.shape_cast %47 : vector<24x1xi1> to vector<24x1xi1>
        %49 = vector.broadcast %48 : vector<24x1xi1> to vector<24x128xi1>
        %50 = vector.broadcast %cst_28 : f32 to vector<24x128xf32>
        %51 = arith.select %49, %41, %50 : vector<24x128xi1>, vector<24x128xf32>
        %cst_29 = arith.constant dense<0xFF800000> : vector<128xf32>
        %52 = vector.multi_reduction <maximumf>, %51, %cst_29 [0] : vector<24x128xf32> to vector<128xf32>
        %53 = vector.shape_cast %52 : vector<128xf32> to vector<1x128xf32>
        %c1_i32_30 = arith.constant 1 : i32
        %54 = vector.broadcast %c1_i32_30 : i32 to vector<24x1xi32>
        %55 = arith.cmpi eq, %45, %54 : vector<24x1xi32>
        %cst_31 = arith.constant 0xFF800000 : f32
        %56 = vector.shape_cast %55 : vector<24x1xi1> to vector<24x1xi1>
        %57 = vector.broadcast %56 : vector<24x1xi1> to vector<24x128xi1>
        %58 = vector.broadcast %cst_31 : f32 to vector<24x128xf32>
        %59 = arith.select %57, %41, %58 : vector<24x128xi1>, vector<24x128xf32>
        %cst_32 = arith.constant dense<0xFF800000> : vector<128xf32>
        %60 = vector.multi_reduction <maximumf>, %59, %cst_32 [0] : vector<24x128xf32> to vector<128xf32>
        %61 = vector.shape_cast %60 : vector<128xf32> to vector<1x128xf32>
        %c2_i32_33 = arith.constant 2 : i32
        %62 = vector.broadcast %c2_i32_33 : i32 to vector<24x1xi32>
        %63 = arith.cmpi eq, %45, %62 : vector<24x1xi32>
        %cst_34 = arith.constant 0xFF800000 : f32
        %64 = vector.shape_cast %63 : vector<24x1xi1> to vector<24x1xi1>
        %65 = vector.broadcast %64 : vector<24x1xi1> to vector<24x128xi1>
        %66 = vector.broadcast %cst_34 : f32 to vector<24x128xf32>
        %67 = arith.select %65, %41, %66 : vector<24x128xi1>, vector<24x128xf32>
        %cst_35 = arith.constant dense<0xFF800000> : vector<128xf32>
        %68 = vector.multi_reduction <maximumf>, %67, %cst_35 [0] : vector<24x128xf32> to vector<128xf32>
        %69 = vector.shape_cast %68 : vector<128xf32> to vector<1x128xf32>
        %c3_i32 = arith.constant 3 : i32
        %70 = vector.broadcast %c3_i32 : i32 to vector<24x1xi32>
        %71 = arith.cmpi eq, %45, %70 : vector<24x1xi32>
        %cst_36 = arith.constant 0xFF800000 : f32
        %72 = vector.shape_cast %71 : vector<24x1xi1> to vector<24x1xi1>
        %73 = vector.broadcast %72 : vector<24x1xi1> to vector<24x128xi1>
        %74 = vector.broadcast %cst_36 : f32 to vector<24x128xf32>
        %75 = arith.select %73, %41, %74 : vector<24x128xi1>, vector<24x128xf32>
        %cst_37 = arith.constant dense<0xFF800000> : vector<128xf32>
        %76 = vector.multi_reduction <maximumf>, %75, %cst_37 [0] : vector<24x128xf32> to vector<128xf32>
        %77 = vector.shape_cast %76 : vector<128xf32> to vector<1x128xf32>
        %c4_i32 = arith.constant 4 : i32
        %78 = vector.broadcast %c4_i32 : i32 to vector<24x1xi32>
        %79 = arith.cmpi eq, %45, %78 : vector<24x1xi32>
        %cst_38 = arith.constant 0xFF800000 : f32
        %80 = vector.shape_cast %79 : vector<24x1xi1> to vector<24x1xi1>
        %81 = vector.broadcast %80 : vector<24x1xi1> to vector<24x128xi1>
        %82 = vector.broadcast %cst_38 : f32 to vector<24x128xf32>
        %83 = arith.select %81, %41, %82 : vector<24x128xi1>, vector<24x128xf32>
        %cst_39 = arith.constant dense<0xFF800000> : vector<128xf32>
        %84 = vector.multi_reduction <maximumf>, %83, %cst_39 [0] : vector<24x128xf32> to vector<128xf32>
        %85 = vector.shape_cast %84 : vector<128xf32> to vector<1x128xf32>
        %c5_i32 = arith.constant 5 : i32
        %86 = vector.broadcast %c5_i32 : i32 to vector<24x1xi32>
        %87 = arith.cmpi eq, %45, %86 : vector<24x1xi32>
        %cst_40 = arith.constant 0xFF800000 : f32
        %88 = vector.shape_cast %87 : vector<24x1xi1> to vector<24x1xi1>
        %89 = vector.broadcast %88 : vector<24x1xi1> to vector<24x128xi1>
        %90 = vector.broadcast %cst_40 : f32 to vector<24x128xf32>
        %91 = arith.select %89, %41, %90 : vector<24x128xi1>, vector<24x128xf32>
        %cst_41 = arith.constant dense<0xFF800000> : vector<128xf32>
        %92 = vector.multi_reduction <maximumf>, %91, %cst_41 [0] : vector<24x128xf32> to vector<128xf32>
        %93 = vector.shape_cast %92 : vector<128xf32> to vector<1x128xf32>
        %c6_i32 = arith.constant 6 : i32
        %94 = vector.broadcast %c6_i32 : i32 to vector<24x1xi32>
        %95 = arith.cmpi eq, %45, %94 : vector<24x1xi32>
        %cst_42 = arith.constant 0xFF800000 : f32
        %96 = vector.shape_cast %95 : vector<24x1xi1> to vector<24x1xi1>
        %97 = vector.broadcast %96 : vector<24x1xi1> to vector<24x128xi1>
        %98 = vector.broadcast %cst_42 : f32 to vector<24x128xf32>
        %99 = arith.select %97, %41, %98 : vector<24x128xi1>, vector<24x128xf32>
        %cst_43 = arith.constant dense<0xFF800000> : vector<128xf32>
        %100 = vector.multi_reduction <maximumf>, %99, %cst_43 [0] : vector<24x128xf32> to vector<128xf32>
        %101 = vector.shape_cast %100 : vector<128xf32> to vector<1x128xf32>
        %c7_i32 = arith.constant 7 : i32
        %102 = vector.broadcast %c7_i32 : i32 to vector<24x1xi32>
        %103 = arith.cmpi eq, %45, %102 : vector<24x1xi32>
        %cst_44 = arith.constant 0xFF800000 : f32
        %104 = vector.shape_cast %103 : vector<24x1xi1> to vector<24x1xi1>
        %105 = vector.broadcast %104 : vector<24x1xi1> to vector<24x128xi1>
        %106 = vector.broadcast %cst_44 : f32 to vector<24x128xf32>
        %107 = arith.select %105, %41, %106 : vector<24x128xi1>, vector<24x128xf32>
        %cst_45 = arith.constant dense<0xFF800000> : vector<128xf32>
        %108 = vector.multi_reduction <maximumf>, %107, %cst_45 [0] : vector<24x128xf32> to vector<128xf32>
        %109 = vector.shape_cast %108 : vector<128xf32> to vector<1x128xf32>
        %110 = tpu.concatenate %53, %61, %69, %77, %85, %93, %101, %109 in 0 : vector<1x128xf32>, vector<1x128xf32>, vector<1x128xf32>, vector<1x128xf32>, vector<1x128xf32>, vector<1x128xf32>, vector<1x128xf32>, vector<1x128xf32> -> vector<8x128xf32>
        %111 = arith.index_cast %34 : i32 to index
        %c0_46 = arith.constant 0 : index
        %112 = vector.load %arg14[%111, %c0_46] : memref<16x128xf32, #tpu.memory_space<vmem>>, vector<8x128xf32>
        %113 = arith.maximumf %112, %110 : vector<8x128xf32>
        %114 = arith.index_cast %34 : i32 to index
        %c0_47 = arith.constant 0 : index
        %115 = vector.load %arg14[%114, %c0_47] : memref<16x128xf32, #tpu.memory_space<vmem>>, vector<8x128xf32>
        tpu.vector_store %arg14[%114, %c0_47], %113 {strides = array<i32>} : memref<16x128xf32, #tpu.memory_space<vmem>>, vector<8x128xf32>,
      } else {
      }
    }
    %c2_i32_20 = arith.constant 2 : i32
    %c0_i32_21 = arith.constant 0 : i32
    %26 = arith.cmpi eq, %arg0, %c0_i32_21 : i32
    %27 = arith.extui %26 : i1 to i32
    %c0_i32_22 = arith.constant 0 : i32
    %28 = arith.cmpi ne, %27, %c0_i32_22 : i32
    scf.if %28 {
      %c0_23 = arith.constant 0 : index
      %c0_24 = arith.constant 0 : index
      %29 = vector.load %arg14[%c0_23, %c0_24] : memref<16x128xf32, #tpu.memory_space<vmem>>, vector<16x128xf32>
      %cst_25 = arith.constant 0xFF800000 : f32
      %30 = vector.broadcast %cst_25 : f32 to vector<16x128xf32>
      %31 = arith.cmpf oeq, %29, %30 : vector<16x128xf32>
      %cst_26 = arith.constant 0.000000e+00 : f32
      %32 = vector.broadcast %cst_26 : f32 to vector<16x128xf32>
      %33 = arith.select %31, %32, %29 : vector<16x128xi1>, vector<16x128xf32>
      %34 = tpu.iota {dimensions = array<i32: 0>} : vector<16x128xi32>
      %c16_i32 = arith.constant 16 : i32
      %35 = vector.broadcast %c16_i32 : i32 to vector<16x128xi32>
      %36 = arith.cmpi slt, %34, %35 : vector<16x128xi32>
      %cst_27 = arith.constant 0.000000e+00 : f32
      %37 = vector.broadcast %cst_27 : f32 to vector<16x128xf32>
      %38 = arith.select %36, %33, %37 : vector<16x128xi1>, vector<16x128xf32>
      %cst_28 = arith.constant dense<0.000000e+00> : vector<128xf32>
      %39 = vector.multi_reduction <add>, %38, %cst_28 [0] : vector<16x128xf32> to vector<128xf32>
      %40 = vector.shape_cast %39 : vector<128xf32> to vector<1x128xf32>
      %cst_29 = arith.constant 6.250000e-02 : f32
      %41 = vector.broadcast %cst_29 : f32 to vector<1x128xf32>
      %42 = arith.mulf %40, %41 : vector<1x128xf32>
      %43 = vector.broadcast %42 : vector<1x128xf32> to vector<16x128xf32>
      %44 = arith.subf %38, %43 : vector<16x128xf32>
      %cst_30 = arith.constant 0.000000e+00 : f32
      %45 = vector.broadcast %cst_30 : f32 to vector<16x128xf32>
      %46 = arith.select %36, %44, %45 : vector<16x128xi1>, vector<16x128xf32>
      %47 = arith.mulf %46, %46 : vector<16x128xf32>
      %cst_31 = arith.constant dense<0.000000e+00> : vector<128xf32>
      %48 = vector.multi_reduction <add>, %47, %cst_31 [0] : vector<16x128xf32> to vector<128xf32>
      %49 = vector.shape_cast %48 : vector<128xf32> to vector<1x128xf32>
      %cst_32 = arith.constant 6.250000e-02 : f32
      %50 = vector.broadcast %cst_32 : f32 to vector<1x128xf32>
      %51 = arith.mulf %49, %50 : vector<1x128xf32>
      %52 = vector.broadcast %42 : vector<1x128xf32> to vector<16x128xf32>
      %53 = arith.subf %38, %52 : vector<16x128xf32>
      %cst_33 = arith.constant 9.99999974E-6 : f32
      %54 = vector.broadcast %cst_33 : f32 to vector<1x128xf32>
      %55 = arith.addf %51, %54 : vector<1x128xf32>
      %56 = math.rsqrt %55 : vector<1x128xf32>
      %57 = vector.broadcast %56 : vector<1x128xf32> to vector<16x128xf32>
      %58 = arith.mulf %53, %57 : vector<16x128xf32>
      %c0_34 = arith.constant 0 : index
      %c0_35 = arith.constant 0 : index
      %59 = vector.load %arg12[%c0_34, %c0_35] : memref<1x128xf32, #tpu.memory_space<vmem>>, vector<1x128xf32>
      %60 = vector.broadcast %59 : vector<1x128xf32> to vector<16x128xf32>
      %61 = arith.mulf %58, %60 : vector<16x128xf32>
      %c0_36 = arith.constant 0 : index
      %c0_37 = arith.constant 0 : index
      %62 = vector.load %arg13[%c0_36, %c0_37] : memref<1x128xf32, #tpu.memory_space<vmem>>, vector<1x128xf32>
      %63 = vector.broadcast %62 : vector<1x128xf32> to vector<16x128xf32>
      %64 = arith.addf %61, %63 : vector<16x128xf32>
      %cst_38 = arith.constant 0.000000e+00 : f32
      %65 = vector.broadcast %cst_38 : f32 to vector<16x128xf32>
      %66 = arith.maximumf %64, %65 : vector<16x128xf32>
      %cst_39 = arith.constant 0.000000e+00 : f32
      %67 = vector.broadcast %cst_39 : f32 to vector<16x128xf32>
      %68 = arith.select %36, %66, %67 : vector<16x128xi1>, vector<16x128xf32>
      %c0_40 = arith.constant 0 : index
      %c0_41 = arith.constant 0 : index
      %69 = vector.load %arg14[%c0_40, %c0_41] : memref<16x128xf32, #tpu.memory_space<vmem>>, vector<16x128xf32>
      tpu.vector_store %arg14[%c0_40, %c0_41], %68 {strides = array<i32>} : memref<16x128xf32, #tpu.memory_space<vmem>>, vector<16x128xf32>,
    } else {
    }
    return
  }
  func.func @transform_0(%arg0: i32, %arg1: memref<1xi32, #tpu.memory_space<smem>>, %arg2: memref<1xi32, #tpu.memory_space<smem>>, %arg3: memref<2xi32, #tpu.memory_space<smem>>) -> (i32, i32) {
    %c0_i32 = arith.constant 0 : i32
    %c0_i32_0 = arith.constant 0 : i32
    return %arg0, %c0_i32 : i32, i32
  }
  func.func @transform_1(%arg0: i32, %arg1: memref<1xi32, #tpu.memory_space<smem>>, %arg2: memref<1xi32, #tpu.memory_space<smem>>, %arg3: memref<2xi32, #tpu.memory_space<smem>>) -> (i32, i32) {
    %c0_i32 = arith.constant 0 : i32
    %c0_i32_0 = arith.constant 0 : i32
    return %arg0, %c0_i32 : i32, i32
  }
  func.func @transform_2(%arg0: i32, %arg1: memref<1xi32, #tpu.memory_space<smem>>, %arg2: memref<1xi32, #tpu.memory_space<smem>>, %arg3: memref<2xi32, #tpu.memory_space<smem>>) -> (i32, i32) {
    %c0_i32 = arith.constant 0 : i32
    %c0_i32_0 = arith.constant 0 : i32
    return %arg0, %c0_i32 : i32, i32
  }
  func.func @transform_3(%arg0: i32, %arg1: memref<1xi32, #tpu.memory_space<smem>>, %arg2: memref<1xi32, #tpu.memory_space<smem>>, %arg3: memref<2xi32, #tpu.memory_space<smem>>) -> (i32, i32) {
    %c0_i32 = arith.constant 0 : i32
    %c0_i32_0 = arith.constant 0 : i32
    %c0_i32_1 = arith.constant 0 : i32
    return %c0_i32, %c0_i32_0 : i32, i32
  }
  func.func @transform_4(%arg0: i32, %arg1: memref<1xi32, #tpu.memory_space<smem>>, %arg2: memref<1xi32, #tpu.memory_space<smem>>, %arg3: memref<2xi32, #tpu.memory_space<smem>>) -> (i32, i32) {
    %c0_i32 = arith.constant 0 : i32
    %c0_i32_0 = arith.constant 0 : i32
    %c0_i32_1 = arith.constant 0 : i32
    return %c0_i32, %c0_i32_0 : i32, i32
  }
  func.func @transform_5(%arg0: i32, %arg1: memref<1xi32, #tpu.memory_space<smem>>, %arg2: memref<1xi32, #tpu.memory_space<smem>>, %arg3: memref<2xi32, #tpu.memory_space<smem>>) -> (i32, i32) {
    %c0_i32 = arith.constant 0 : i32
    %c0_i32_0 = arith.constant 0 : i32
    %c0_i32_1 = arith.constant 0 : i32
    return %c0_i32, %c0_i32_0 : i32, i32
  }
  func.func @transform_6(%arg0: i32, %arg1: memref<1xi32, #tpu.memory_space<smem>>, %arg2: memref<1xi32, #tpu.memory_space<smem>>, %arg3: memref<2xi32, #tpu.memory_space<smem>>) -> (i32, i32) {
    %c0_i32 = arith.constant 0 : i32
    %c0_i32_0 = arith.constant 0 : i32
    %c0_i32_1 = arith.constant 0 : i32
    return %c0_i32, %c0_i32_0 : i32, i32
  }
  func.func @transform_7(%arg0: i32, %arg1: memref<1xi32, #tpu.memory_space<smem>>, %arg2: memref<1xi32, #tpu.memory_space<smem>>, %arg3: memref<2xi32, #tpu.memory_space<smem>>) -> (i32, i32) {
    %c0_i32 = arith.constant 0 : i32
    %c0_i32_0 = arith.constant 0 : i32
    %c0_i32_1 = arith.constant 0 : i32
    return %c0_i32, %c0_i32_0 : i32, i32
  }
  func.func @transform_8(%arg0: i32, %arg1: memref<1xi32, #tpu.memory_space<smem>>, %arg2: memref<1xi32, #tpu.memory_space<smem>>, %arg3: memref<2xi32, #tpu.memory_space<smem>>) -> (i32, i32) {
    %c0_i32 = arith.constant 0 : i32
    %c0_i32_0 = arith.constant 0 : i32
    %c0_i32_1 = arith.constant 0 : i32
    return %c0_i32, %c0_i32_0 : i32, i32
  }
  func.func @transform_9(%arg0: i32, %arg1: memref<1xi32, #tpu.memory_space<smem>>, %arg2: memref<1xi32, #tpu.memory_space<smem>>, %arg3: memref<2xi32, #tpu.memory_space<smem>>) -> (i32, i32) {
    %c0_i32 = arith.constant 0 : i32
    %c0_i32_0 = arith.constant 0 : i32
    %c0_i32_1 = arith.constant 0 : i32
    return %c0_i32, %c0_i32_0 : i32, i32
  }
  func.func @transform_10(%arg0: i32, %arg1: memref<1xi32, #tpu.memory_space<smem>>, %arg2: memref<1xi32, #tpu.memory_space<smem>>, %arg3: memref<2xi32, #tpu.memory_space<smem>>) -> (i32, i32) {
    %c0_i32 = arith.constant 0 : i32
    %c0_i32_0 = arith.constant 0 : i32
    %c0_i32_1 = arith.constant 0 : i32
    return %c0_i32, %c0_i32_0 : i32, i32
  }
}

</mosaic_0001>

<bundles_post_ra>
// kernel: tpu_custom_call.1
= control target key start
LH: loop header
LB: loop body
LE: loop exit
PB: predicated region body
PF: predicated region fallthrough
CT: control target
= control target key end

     0   :  { %s1250_s0 = inlined_call_operand.<no memory space> [shape: s32[1], index: 0, kind: input, shape index: {}]   ;;  %s1251_s1 = inlined_call_operand.<no memory space> [shape: s32[1], index: 1, kind: input, shape index: {}]   ;;  %s1252_s2 = inlined_call_operand.vmem [shape: s32[2], index: 2, kind: input, shape index: {}]   ;;  %s1253_s3 = inlined_call_operand.vmem [shape: f32[32,8], index: 3, kind: input, shape index: {}]   ;;  %s1254_s4 = inlined_call_operand.vmem [shape: f32[32,8], index: 4, kind: input, shape index: {}]   ;;  %s1255_s5 = inlined_call_operand.vmem [shape: s32[32,1], index: 5, kind: input, shape index: {}]   ;;  %s1256_s6 = inlined_call_operand.vmem [shape: f32[8,128], index: 6, kind: input, shape index: {}]   ;;  %s1257_s7 = inlined_call_operand.vmem [shape: f32[8,128], index: 7, kind: input, shape index: {}]   ;;  %s1258_s8 = inlined_call_operand.vmem [shape: f32[1,128], index: 8, kind: input, shape index: {}]   ;;  %s1259_s9 = inlined_call_operand.vmem [shape: f32[128,128], index: 9, kind: input, shape index: {}]   ;;  %s1260_s10 = inlined_call_operand.vmem [shape: f32[1,128], index: 10, kind: input, shape index: {}]   ;;  %s1261_s11 = inlined_call_operand.vmem [shape: f32[1,128], index: 11, kind: input, shape index: {}]   ;;  %s1262_s12 = inlined_call_operand.vmem [shape: f32[1,128], index: 12, kind: input, shape index: {}]   ;;  %s1263_s13 = inlined_call_operand.hbm [shape: f32[16,128], index: 13, kind: output, shape index: {}]  }
   0x1   :  { %s20_s27 = sshll.u32 %s1252_s2, 4  ;;  %s21_s27 = int_to_ptr.vmem [resolvable:$true] %s20_s27 }
   0x2   :  { %s908_s28 = scalar_lea.vmem %s21_s27, 16  ;;  %p913_p1 = scmp.lt.s32.totalorder %s21_s27, %s21_s27 }
   0x3   :  { %p909_p0 = scmp.ne.s32.totalorder %s21_s27, %s908_s28  ;;  %p914_p2 = scmp.lt.s32.totalorder %s908_s28, %s908_s28 }
   0x5   :  { %p915_p3 = por %p914_p2, %p913_p1 }
   0x7   :  { %p916_p4 = pnand %p915_p3, %p909_p0 }
   0x9   :  { %919 = shalt.err (!%p916_p4)  }
   0xa   :  { %s954_s29 = smov [#allocation6]  }
   0xb   :  { %23 = dma.vmem_to_smem %s21_s27, 16, %s954_s29, [#allocation3] }
   0xc   :  { %946 = dma.done.wait [#allocation3], 16 }
   0xd   :  { %947 = vsyncadd [#allocation3], 4294967280 }
   0xe   :  { %25 = sfence }
   0xf   :  { %26 = vsyncpa [#allocation8], 0  ;;  %v62_v0 = vld [vmem:[%s1257_s7] sm:$0xff]  ;;  %vm63_vm0 = vcmask 64512   ;;  %v955_v2 = vmov -inf   ;;  %v59_v3 = vld [vmem:[%s1254_s4 + $0x8] sm:$0xff] }
  0x10   :  { %v58_v1 = vld [vmem:[%s1254_s4] sm:$0xff]  ;;  %51 = vst [vmem:[#allocation7] sm:$0xff] %v955_v2  ;;  %52 = vst [vmem:[#allocation7 + $0x8] sm:$0xff] %v955_v2  ;;  %800 = vmatprep.subr.mxu0 %v62_v0  ;;  %v60_v5 = vld [vmem:[%s1254_s4 + $0x10] sm:$0xff] }
  0x11   :  { %802 = vmatprep.mubr.msk.f32.mxu0 %vm63_vm0, %v58_v1  ;;  %v57_v4 = vld [vmem:[%s1256_s6] sm:$0xff]  ;;  %801 = vmatpush3.msra.mxu0 %v62_v0  ;;  %v61_v6 = vld [vmem:[%s1254_s4 + $0x18] sm:$0xff]  ;;  %v274_v8 = vld [vmem:[%s1259_s9 + $0x8] sm:$0xff] }
  0x12   :  { %803 = vmatmul.mubr.msk.f32.vlgmr.msra.gmra.mrb[0].mxu0 %vm63_vm0, %v59_v3  ;;  %808 = vmatprep.subr.mxu0 %v57_v4  ;;  %v273_v7 = vld [vmem:[%s1259_s9] sm:$0xff]  ;;  %v275_v9 = vld [vmem:[%s1259_s9 + $0x10] sm:$0xff]  ;;  %v276_v10 = vld [vmem:[%s1259_s9 + $0x18] sm:$0xff] }
  0x13   :  { %809 = vmatpush3.msra.mxu0 %v57_v4  ;;  %805 = vmatprep.mubr.msk.f32.mxu0 %vm63_vm0, %v60_v5  ;;  %v53_v11 = vld [vmem:[%s1253_s3] sm:$0xff]  ;;  %v854_v12 = vpack.c.bf16 %v274_v8, %v273_v7  ;;  %v858_v13 = vpack.c.bf16 %v276_v10, %v275_v9  ;;  %v278_v15 = vld [vmem:[%s1259_s9 + $0x28] sm:$0xff]  ;;  %v55_v17 = vld [vmem:[%s1253_s3 + $0x10] sm:$0xff] }
  0x14   :  { %v277_v14 = vld [vmem:[%s1259_s9 + $0x20] sm:$0xff]  ;;  %v54_v16 = vld [vmem:[%s1253_s3 + $0x8] sm:$0xff]  ;;  %v279_v19 = vld [vmem:[%s1259_s9 + $0x30] sm:$0xff] }
  0x15   :  { %855 = vmatprep.subr.bf16.mxu1 %v854_v12  ;;  %v862_v18 = vpack.c.bf16 %v278_v15, %v277_v14  ;;  %v280_v20 = vld [vmem:[%s1259_s9 + $0x38] sm:$0xff]  ;;  %v281_v23 = vld [vmem:[%s1259_s9 + $0x40] sm:$0xff]  ;;  %v282_v24 = vld [vmem:[%s1259_s9 + $0x48] sm:$0xff] }
  0x16   :  { %806 = vmatmul.mubr.msk.f32.gmra.mrb[2].mxu0 %vm63_vm0, %v61_v6  ;;  %857 = vmatpush3.bf16.msra.mxu1 %v854_v12  ;;  %v56_v21 = vld [vmem:[%s1253_s3 + $0x18] sm:$0xff]  ;;  %v866_v22 = vpack.c.bf16 %v280_v20, %v279_v19  ;;  %v870_v25 = vpack.c.bf16 %v282_v24, %v281_v23  ;;  %v283_v26 = vld [vmem:[%s1259_s9 + $0x50] sm:$0xff]  ;;  %v285_v29 = vld [vmem:[%s1259_s9 + $0x60] sm:$0xff] }
  0x17   :  { %810 = vmatprep.mubr.msk.f32.mxu0 %vm63_vm0, %v53_v11  ;;  %859 = vmatprep.subr.bf16.mxu1 %v858_v13  ;;  %v284_v27 = vld [vmem:[%s1259_s9 + $0x58] sm:$0xff]  ;;  %v286_v30 = vld [vmem:[%s1259_s9 + $0x68] sm:$0xff]  ;;  %v287_v32 = vld [vmem:[%s1259_s9 + $0x70] sm:$0xff] }
  0x18   :  { %v874_v28 = vpack.c.bf16 %v284_v27, %v283_v26  ;;  %v878_v31 = vpack.c.bf16 %v286_v30, %v285_v29  ;;  %v288_v33 = vld [vmem:[%s1259_s9 + $0x78] sm:$0xff]  ;;  %v764_v35 = vld [vmem:[%s1258_s8] ss:$0 sm:$0xff]  ;;  %s1125_s8 = smov 0  }
  0x19   :  { %v882_v34 = vpack.c.bf16 %v288_v33, %v287_v32  ;;  %v765_v48 = vld [vmem:[%s1260_s10] ss:$0 sm:$0xff] }
  0x1a   :  { %811 = vmatmul.mubr.msk.f32.vlgmr.msra.gmra.mrb[0].mxu0 %vm63_vm0, %v54_v16  ;;  %861 = vmatpush3.bf16.msra.mxu1 %v858_v13 }
  0x1b   :  { %813 = vmatprep.mubr.msk.f32.mxu0 %vm63_vm0, %v55_v17  ;;  %863 = vmatprep.subr.bf16.mxu1 %v862_v18 }
  0x1e   :  { %814 = vmatmul.mubr.msk.f32.gmra.mrb[2].mxu0 %vm63_vm0, %v56_v21  ;;  %865 = vmatpush3.bf16.msra.mxu1 %v862_v18 }
  0x1f   :  { %867 = vmatprep.subr.bf16.mxu1 %v866_v22 }
  0x22   :  { %869 = vmatpush3.bf16.msra.mxu1 %v866_v22 }
  0x23   :  { %871 = vmatprep.subr.bf16.mxu1 %v870_v25 }
  0x26   :  { %873 = vmatpush3.bf16.msra.mxu1 %v870_v25 }
  0x27   :  { %875 = vmatprep.subr.bf16.mxu1 %v874_v28 }
  0x2a   :  { %877 = vmatpush3.bf16.msra.mxu1 %v874_v28 }
  0x2b   :  { %879 = vmatprep.subr.bf16.mxu1 %v878_v31 }
  0x2e   :  { %881 = vmatpush3.bf16.msra.mxu1 %v878_v31 }
  0x2f   :  { %883 = vmatprep.subr.bf16.mxu1 %v882_v34 }
  0x32   :  { %885 = vmatpush3.bf16.msra.mxu1 %v882_v34 }
  0xed   :  { %v812_v36 = vpop.f32.mrb[0].mxu0 }
  0xee   :  { %v266_v37 = vadd.f32 %v812_v36, %v764_v35  ;;  %v239_v38 = vpop.f32.mrb[1].mxu0 }
  0xef   :  { %v265_v39 = vadd.f32 %v764_v35, %v239_v38 }
  0xf0   :  { %v270_v42 = vmax.f32 %v266_v37, 0.0 }
  0xf1   :  { %v815_v40 = vpop.f32.mrb[2].mxu0  ;;  %v269_v41 = vmax.f32 %v265_v39, 0.0 }
  0xf2   :  { %v268_v43 = vadd.f32 %v815_v40, %v764_v35  ;;  %v249_v44 = vpop.f32.mrb[3].mxu0 }
  0xf3   :  { %v267_v45 = vadd.f32 %v764_v35, %v249_v44  ;;  %848 = vmatprep.mubr.f32.mxu1 %v269_v41 }
  0xf4   :  { %849 = vmatmul.mubr.f32.vlgmr.msra.gmra.mrb[0].mxu1 %v270_v42  ;;  %v272_v47 = vmax.f32 %v268_v43, 0.0 }
  0xf5   :  { %v271_v46 = vmax.f32 %v267_v45, 0.0 }
  0xf7   :  { %851 = vmatprep.mubr.f32.mxu1 %v271_v46 }
  0xf8   :  { %852 = vmatmul.mubr.f32.gmra.mrb[2].mxu1 %v272_v47 }
 0x1c7   :  { %v850_v49 = vpop.f32.mrb[0].mxu1 }
 0x1c8   :  { %v368_v50 = vadd.f32 %v850_v49, %v765_v48  ;;  %v362_v51 = vpop.f32.mrb[1].mxu1 }
 0x1c9   :  { %v363_v52 = vadd.f32 %v765_v48, %v362_v51 }
 0x1ca   :  { %382 = vst [vmem:[#allocation2 + $0x8] sm:$0xff] %v368_v50 }
 0x1cb   :  { %381 = vst [vmem:[#allocation2] sm:$0xff] %v363_v52  ;;  %v853_v53 = vpop.f32.mrb[2].mxu1 }
 0x1cc   :  { %v378_v54 = vadd.f32 %v853_v53, %v765_v48  ;;  %v372_v55 = vpop.f32.mrb[3].mxu1 }
 0x1cd   :  { %v373_v56 = vadd.f32 %v765_v48, %v372_v55 }
 0x1ce   :  { %384 = vst [vmem:[#allocation2 + $0x18] sm:$0xff] %v378_v54 }
 0x1cf   :  { %383 = vst [vmem:[#allocation2 + $0x10] sm:$0xff] %v373_v56 }
 0x1d0 LB: > { %s1134_s24 = sadd.s32 %s952_s8, %s1250_s0  ;;  %s952_s8 = sphi %s1125_s8, %s392_s8  }
 0x1d1   : > { %p766_p5 = scmp.gt.s32.totalorder %s1134_s24, %s1251_s1 }
 0x1d2   : > { %s1141_s26 = sld [smem:[#allocation6 + %s952_s8]] (!%p766_p5)  ;;  %v956_v57 = vmov (!%p766_p5), 0   ;;  %s767_s27 = sshll.u32 (!%p766_p5), %s1134_s24, 3 }
 0x1d3   : > { %397 = sbr.rel (%p766_p5) target bundleno = 671 (0x29f), region = 56  ;;  %905 = vset.pattern.permute.xlu1 (!%p766_p5), %v956_v57  ;;  %904 = vset.pattern.permute.xlu0 (!%p766_p5), %v956_v57  ;;  %v410_v58 = vstv (!%p766_p5), %s767_s27  ;;  %s660_s30 = scalar_lea.vmem (!%p766_p5), [#allocation7], %s767_s27 }
 0x1d8   : > { %s406_s4 = scalar_lea.vmem (!%p766_p5), %s1255_s5, %s1141_s26  ;;  %s402_s3 = scalar_lea.vmem (!%p766_p5), [#allocation2], %s1141_s26 }
 0x1d9   : > { %v407_v59 = vld [vmem:[%s406_s4] sm:$0xff] (!%p766_p5)  ;;  %v408_v60 = vld [vmem:[%s406_s4 + $0x8] sm:$0xff] (!%p766_p5)  ;;  %v409_v1 = vld [vmem:[%s406_s4 + $0x10] sm:$0xff] (!%p766_p5) }
 0x1da   : > { %v1152_v61 = vsub.s32 %v407_v59, %v410_v58  ;;  %v1154_v62 = vsub.s32 %v408_v60, %v410_v58  ;;  %v413_v4 = vsub.s32 %v409_v1, %v410_v58  ;;  %v1197_v35 = vld [vmem:[%s402_s3 + $0x8] sm:$0xff]  ;;  %v1199_v38 = vld [vmem:[%s402_s3] sm:$0xff]  ;;  %v1201_v39 = vld [vmem:[%s402_s3 + $0x10] sm:$0xff] }
 0x1dc   : > { %vm443_vm1 = vcmp.eq.s32.totalorder %v1152_v61, 1  ;;  %vm414_vm2 = vcmp.eq.s32.totalorder %v1152_v61, 0  ;;  %vm444_vm3 = vcmp.eq.s32.totalorder %v1154_v62, 1  ;;  %vm415_vm4 = vcmp.eq.s32.totalorder %v1154_v62, 0 }
 0x1dd   : > { %v446_v63 = vsel %vm443_vm1, 1, %v956_v57  ;;  %v417_v0 = vsel %vm414_vm2, 1, %v956_v57  ;;  %v447_v2 = vsel %vm444_vm3, 1, %v956_v57  ;;  %v418_v3 = vsel %vm415_vm4, 1, %v956_v57 }
 0x1de   : > { %450 = vperm.xlu1 %905, %v446_v63   ;;  %421 = vperm.xlu0 %904, %v417_v0   ;;  %vm473_vm5 = vcmp.eq.s32.totalorder %v1154_v62, 2  ;;  %vm472_vm6 = vcmp.eq.s32.totalorder %v1152_v61, 2  ;;  %vm445_vm7 = vcmp.eq.s32.totalorder %v413_v4, 1  ;;  %vm416_vm8 = vcmp.eq.s32.totalorder %v413_v4, 0 }
 0x1df   : > { %v476_v5 = vsel %vm473_vm5, 1, %v956_v57  ;;  %v475_v6 = vsel %vm472_vm6, 1, %v956_v57  ;;  %v448_v7 = vsel %vm445_vm7, 1, %v956_v57  ;;  %v419_v8 = vsel %vm416_vm8, 1, %v956_v57 }
 0x1e0   : > { %vm502_vm9 = vcmp.eq.s32.totalorder %v1154_v62, 3  ;;  %vm501_vm10 = vcmp.eq.s32.totalorder %v1152_v61, 3  ;;  %vm530_vm11 = vcmp.eq.s32.totalorder %v1152_v61, 4  ;;  %vm474_vm12 = vcmp.eq.s32.totalorder %v413_v4, 2 }
 0x1e1   : > { %v505_v9 = vsel %vm502_vm9, 1, %v956_v57  ;;  %v504_v10 = vsel %vm501_vm10, 1, %v956_v57  ;;  %v533_v11 = vsel %vm530_vm11, 1, %v956_v57  ;;  %v477_v12 = vsel %vm474_vm12, 1, %v956_v57 }
 0x1e2   : > { %453 = vperm.xlu1 %905, %v447_v2   ;;  %424 = vperm.xlu0 %904, %v418_v3   ;;  %vm503_vm13 = vcmp.eq.s32.totalorder %v413_v4, 3  ;;  %vm531_vm14 = vcmp.eq.s32.totalorder %v1154_v62, 4  ;;  %vm560_vm15 = vcmp.eq.s32.totalorder %v1154_v62, 5  ;;  %vm559_vm0 = vcmp.eq.s32.totalorder %v1152_v61, 5 }
 0x1e3   : > { %v506_v13 = vsel %vm503_vm13, 1, %v956_v57  ;;  %v534_v14 = vsel %vm531_vm14, 1, %v956_v57  ;;  %v563_v15 = vsel %vm560_vm15, 1, %v956_v57  ;;  %v562_v16 = vsel %vm559_vm0, 1, %v956_v57 }
 0x1e4   : > { %vm588_vm1 = vcmp.eq.s32.totalorder %v1152_v61, 6  ;;  %vm532_vm2 = vcmp.eq.s32.totalorder %v413_v4, 4  ;;  %vm561_vm3 = vcmp.eq.s32.totalorder %v413_v4, 5  ;;  %vm589_vm4 = vcmp.eq.s32.totalorder %v1154_v62, 6 }
 0x1e5   : > { %v591_v17 = vsel %vm588_vm1, 1, %v956_v57  ;;  %v535_v18 = vsel %vm532_vm2, 1, %v956_v57  ;;  %v564_v19 = vsel %vm561_vm3, 1, %v956_v57  ;;  %v592_v20 = vsel %vm589_vm4, 1, %v956_v57 }
 0x1e6   : > { %482 = vperm.xlu1 %905, %v476_v5   ;;  %479 = vperm.xlu0 %904, %v475_v6   ;;  %vm618_vm5 = vcmp.eq.s32.totalorder %v1154_v62, 7  ;;  %vm617_vm6 = vcmp.eq.s32.totalorder %v1152_v61, 7  ;;  %vm619_vm7 = vcmp.eq.s32.totalorder %v413_v4, 7  ;;  %vm590_vm8 = vcmp.eq.s32.totalorder %v413_v4, 6 }
 0x1e7   : > { %v621_v21 = vsel %vm618_vm5, 1, %v956_v57  ;;  %v620_v22 = vsel %vm617_vm6, 1, %v956_v57  ;;  %v622_v23 = vsel %vm619_vm7, 1, %v956_v57  ;;  %v593_v24 = vsel %vm590_vm8, 1, %v956_v57 }
 0x1ea   : > { %456 = vperm.xlu1 %905, %v448_v7   ;;  %427 = vperm.xlu0 %904, %v419_v8  }
 0x1ee   : > { %511 = vperm.xlu1 %905, %v505_v9   ;;  %508 = vperm.xlu0 %904, %v504_v10  }
 0x1f2   : > { %537 = vperm.xlu1 %905, %v533_v11   ;;  %485 = vperm.xlu0 %904, %v477_v12  }
 0x1f6   : > { %514 = vperm.xlu1 %905, %v506_v13   ;;  %540 = vperm.xlu0 %904, %v534_v14  }
 0x1fa   : > { %569 = vperm.xlu1 %905, %v563_v15   ;;  %566 = vperm.xlu0 %904, %v562_v16  }
 0x1fe   : > { %595 = vperm.xlu1 %905, %v591_v17   ;;  %543 = vperm.xlu0 %904, %v535_v18  }
 0x202   : > { %572 = vperm.xlu1 %905, %v564_v19   ;;  %598 = vperm.xlu0 %904, %v592_v20  }
 0x206   : > { %627 = vperm.xlu1 %905, %v621_v21   ;;  %624 = vperm.xlu0 %904, %v620_v22  }
 0x20a   : > { %630 = vperm.xlu1 %905, %v622_v23   ;;  %601 = vperm.xlu0 %904, %v593_v24  }
 0x25d   : > { %v451_v25 = vpop.permute.xlu1 %450  ;;  %v422_v26 = vpop.permute.xlu0 %421 }
 0x25e   : > { %vm458_vm13 = vcmp.eq.s32.totalorder %v451_v25, 1  ;;  %vm429_vm14 = vcmp.eq.s32.totalorder %v422_v26, 1 }
 0x25f   : > { %v461_v44 = vsel %vm458_vm13, %v1199_v38, -inf  ;;  %v432_v45 = vsel %vm429_vm14, %v1199_v38, -inf }
 0x261   : > { %v454_v27 = vpop.permute.xlu1 %453  ;;  %v425_v28 = vpop.permute.xlu0 %424 }
 0x262   : > { %vm459_vm9 = vcmp.eq.s32.totalorder %v454_v27, 1  ;;  %vm430_vm10 = vcmp.eq.s32.totalorder %v425_v28, 1 }
 0x263   : > { %v462_v40 = vsel %vm459_vm9, %v1197_v35, -inf  ;;  %v433_v41 = vsel %vm430_vm10, %v1197_v35, -inf }
 0x264   : > { %v464_v53 = vmax.f32 %v461_v44, %v462_v40  ;;  %v435_v54 = vmax.f32 %v432_v45, %v433_v41 }
 0x265   : > { %v483_v29 = vpop.permute.xlu1 %482  ;;  %v480_v30 = vpop.permute.xlu0 %479 }
 0x266   : > { %vm488_vm11 = vcmp.eq.s32.totalorder %v483_v29, 1  ;;  %vm487_vm12 = vcmp.eq.s32.totalorder %v480_v30, 1 }
 0x267   : > { %v491_v42 = vsel %vm488_vm11, %v1197_v35, -inf  ;;  %v490_v43 = vsel %vm487_vm12, %v1199_v38, -inf }
 0x268   : > { %v493_v55 = vmax.f32 %v490_v43, %v491_v42 }
 0x269   : > { %v457_v31 = vpop.permute.xlu1 %456  ;;  %v428_v32 = vpop.permute.xlu0 %427 }
 0x26a   : > { %vm460_vm15 = vcmp.eq.s32.totalorder %v457_v31, 1  ;;  %vm431_vm0 = vcmp.eq.s32.totalorder %v428_v32, 1 }
 0x26b   : > { %v463_v46 = vsel %vm460_vm15, %v1201_v39, -inf  ;;  %v434_v47 = vsel %vm431_vm0, %v1201_v39, -inf }
 0x26c   : > { %v465_v57 = vmax.f32 %v464_v53, %v463_v46  ;;  %v436_v58 = vmax.f32 %v435_v54, %v434_v47 }
 0x26d   : > { %v512_v33 = vpop.permute.xlu1 %511  ;;  %v509_v34 = vpop.permute.xlu0 %508 }
 0x26e   : > { %vm517_vm1 = vcmp.eq.s32.totalorder %v512_v33, 1  ;;  %vm516_vm2 = vcmp.eq.s32.totalorder %v509_v34, 1  ;;  %v466_v1 = vrot.slane %v465_v57, 4  ;;  %v437_v2 = vrot.slane %v436_v58, 4 }
 0x26f   : > { %v520_v50 = vsel %vm517_vm1, %v1197_v35, -inf  ;;  %v519_v51 = vsel %vm516_vm2, %v1199_v38, -inf  ;;  %vm646_vm1 = vcmask 1040384   ;;  %vm648_vm2 = vcmask 1041408  }
 0x270   : > { %v522_v59 = vmax.f32 %v519_v51, %v520_v50  ;;  %v467_v13 = vmax.f32 %v465_v57, %v466_v1  ;;  %v438_v14 = vmax.f32 %v436_v58, %v437_v2 }
 0x271   : > { %v538_v36 = vpop.permute.xlu1 %537  ;;  %v486_v37 = vpop.permute.xlu0 %485 }
 0x272   : > { %vm489_vm3 = vcmp.eq.s32.totalorder %v486_v37, 1  ;;  %vm545_vm6 = vcmp.eq.s32.totalorder %v538_v36, 1  ;;  %v468_v24 = vrot.slane %v467_v13, 2  ;;  %v439_v25 = vrot.slane %v438_v14, 2 }
 0x273   : > { %v492_v52 = vsel %vm489_vm3, %v1201_v39, -inf  ;;  %v548_v3 = vsel %vm545_vm6, %v1199_v38, -inf  ;;  %vm650_vm3 = vcmask 1042432   ;;  %vm656_vm6 = vcmask 1045504  }
 0x274   : > { %v494_v60 = vmax.f32 %v493_v55, %v492_v52  ;;  %v469_v40 = vmax.f32 %v467_v13, %v468_v24  ;;  %v440_v41 = vmax.f32 %v438_v14, %v439_v25 }
 0x275   : > { %v515_v48 = vpop.permute.xlu1 %514  ;;  %v541_v49 = vpop.permute.xlu0 %540 }
 0x276   : > { %vm518_vm4 = vcmp.eq.s32.totalorder %v515_v48, 1  ;;  %vm546_vm5 = vcmp.eq.s32.totalorder %v541_v49, 1  ;;  %v495_v4 = vrot.slane %v494_v60, 4  ;;  %v470_v53 = vrot.slane %v469_v40, 1 }
 0x277   : > { %v521_v56 = vsel %vm518_vm4, %v1201_v39, -inf  ;;  %v549_v0 = vsel %vm546_vm5, %v1197_v35, -inf  ;;  %vm652_vm4 = vcmask 1043456   ;;  %vm654_vm5 = vcmask 1044480  }
 0x278   : > { %v523_v63 = vmax.f32 %v522_v59, %v521_v56  ;;  %v551_v7 = vmax.f32 %v548_v3, %v549_v0  ;;  %v496_v15 = vmax.f32 %v494_v60, %v495_v4 }
 0x279   : > { %v570_v61 = vpop.permute.xlu1 %569  ;;  %v567_v62 = vpop.permute.xlu0 %566 }
 0x27a   : > { %vm575_vm7 = vcmp.eq.s32.totalorder %v570_v61, 1  ;;  %vm574_vm8 = vcmp.eq.s32.totalorder %v567_v62, 1  ;;  %v524_v8 = vrot.slane %v523_v63, 4  ;;  %v497_v26 = vrot.slane %v496_v15, 2 }
 0x27b   : > { %v578_v9 = vsel %vm575_vm7, %v1197_v35, -inf  ;;  %v577_v10 = vsel %vm574_vm8, %v1199_v38, -inf  ;;  %v471_v62 = vmax.f32 %v469_v40, %v470_v53  ;;  %vm658_vm7 = vcmask 1046528  }
 0x27c   : > { %v580_v18 = vmax.f32 %v577_v10, %v578_v9  ;;  %v525_v20 = vmax.f32 %v523_v63, %v524_v8  ;;  %v498_v42 = vmax.f32 %v496_v15, %v497_v26 }
 0x27d   : > { %v596_v5 = vpop.permute.xlu1 %595  ;;  %v544_v6 = vpop.permute.xlu0 %543 }
 0x27e   : > { %vm547_vm9 = vcmp.eq.s32.totalorder %v544_v6, 1  ;;  %vm603_vm12 = vcmp.eq.s32.totalorder %v596_v5, 1  ;;  %v526_v31 = vrot.slane %v525_v20, 2  ;;  %v499_v55 = vrot.slane %v498_v42, 1 }
 0x27f   : > { %v550_v11 = vsel %vm547_vm9, %v1201_v39, -inf  ;;  %v606_v33 = vsel %vm603_vm12, %v1199_v38, -inf }
 0x280   : > { %v552_v12 = vmax.f32 %v551_v7, %v550_v11  ;;  %v527_v48 = vmax.f32 %v525_v20, %v526_v31  ;;  %v500_v1 = vmax.f32 %v498_v42, %v499_v55 }
 0x281   : > { %v573_v16 = vpop.permute.xlu1 %572  ;;  %v599_v17 = vpop.permute.xlu0 %598 }
 0x282   : > { %v553_v19 = vrot.slane %v552_v12, 4  ;;  %vm576_vm10 = vcmp.eq.s32.totalorder %v573_v16, 1  ;;  %vm604_vm11 = vcmp.eq.s32.totalorder %v599_v17, 1  ;;  %v528_v58 = vrot.slane %v527_v48, 1  ;;  %v661_v17 = vld [vmem:[%s660_s30] sm:$0xff] }
 0x283   : > { %v579_v21 = vsel %vm576_vm10, %v1201_v39, -inf  ;;  %v607_v30 = vsel %vm604_vm11, %v1197_v35, -inf }
 0x284   : > { %v554_v22 = vmax.f32 %v552_v12, %v553_v19  ;;  %v581_v23 = vmax.f32 %v580_v18, %v579_v21  ;;  %v609_v43 = vmax.f32 %v606_v33, %v607_v30  ;;  %v529_v3 = vmax.f32 %v527_v48, %v528_v58 }
 0x285   : > { %v628_v27 = vpop.permute.xlu1 %627  ;;  %v625_v28 = vpop.permute.xlu0 %624 }
 0x286   : > { %v582_v29 = vrot.slane %v581_v23, 4  ;;  %vm633_vm13 = vcmp.eq.s32.totalorder %v628_v27, 1  ;;  %vm632_vm14 = vcmp.eq.s32.totalorder %v625_v28, 1  ;;  %v555_v34 = vrot.slane %v554_v22, 2 }
 0x287   : > { %v636_v32 = vsel %vm633_vm13, %v1197_v35, -inf  ;;  %v635_v37 = vsel %vm632_vm14, %v1199_v38, -inf  ;;  %v441_v38 = vrot.slane %v440_v41, 1 }
 0x288   : > { %v583_v36 = vmax.f32 %v581_v23, %v582_v29  ;;  %v638_v47 = vmax.f32 %v635_v37, %v636_v32  ;;  %v556_v50 = vmax.f32 %v554_v22, %v555_v34 }
 0x289   : > { %v631_v44 = vpop.permute.xlu1 %630  ;;  %v602_v45 = vpop.permute.xlu0 %601  ;;  %v442_v63 = vmax.f32 %v440_v41, %v441_v38 }
 0x28a   : > { %v584_v46 = vrot.slane %v583_v36, 2  ;;  %vm634_vm15 = vcmp.eq.s32.totalorder %v631_v44, 1  ;;  %vm605_vm0 = vcmp.eq.s32.totalorder %v602_v45, 1  ;;  %v557_v59 = vrot.slane %v556_v50, 1 }
 0x28b   : > { %v637_v35 = vsel %vm634_vm15, %v1201_v39, -inf  ;;  %v608_v49 = vsel %vm605_vm0, %v1201_v39, -inf  ;;  %v647_v7 = vsel %vm646_vm1, %v442_v63, %v471_v62 }
 0x28c   : > { %v639_v51 = vmax.f32 %v638_v47, %v637_v35  ;;  %v610_v52 = vmax.f32 %v609_v43, %v608_v49  ;;  %v585_v54 = vmax.f32 %v583_v36, %v584_v46  ;;  %v558_v4 = vmax.f32 %v556_v50, %v557_v59 }
 0x28d   : > { %v649_v9 = vsel %vm648_vm2, %v647_v7, %v500_v1 }
 0x28e   : > { %v640_v56 = vrot.slane %v639_v51, 4  ;;  %v611_v57 = vrot.slane %v610_v52, 4  ;;  %v586_v0 = vrot.slane %v585_v54, 1  ;;  %v651_v12 = vsel %vm650_vm3, %v649_v9, %v529_v3 }
 0x28f   : > { %v653_v13 = vsel %vm652_vm4, %v651_v12, %v558_v4 }
 0x290   : > { %v641_v60 = vmax.f32 %v639_v51, %v640_v56  ;;  %v612_v61 = vmax.f32 %v610_v52, %v611_v57  ;;  %v587_v8 = vmax.f32 %v585_v54, %v586_v0 }
 0x292   : > { %v642_v2 = vrot.slane %v641_v60, 2  ;;  %v613_v39 = vrot.slane %v612_v61, 2  ;;  %v655_v16 = vsel %vm654_vm5, %v653_v13, %v587_v8 }
 0x294   : > { %v643_v5 = vmax.f32 %v641_v60, %v642_v2  ;;  %v614_v6 = vmax.f32 %v612_v61, %v613_v39 }
 0x296   : > { %v644_v10 = vrot.slane %v643_v5, 1  ;;  %v615_v11 = vrot.slane %v614_v6, 1 }
 0x298   : > { %v645_v14 = vmax.f32 %v643_v5, %v644_v10  ;;  %v616_v15 = vmax.f32 %v614_v6, %v615_v11 }
 0x29a   : > { %v657_v18 = vsel %vm656_vm6, %v655_v16, %v616_v15 }
 0x29b   : > { %v659_v19 = vsel %vm658_vm7, %v657_v18, %v645_v14 }
 0x29c   : > { %v662_v20 = vmax.f32 %v661_v17, %v659_v19 }
 0x29e   : > { %663 = vst [vmem:[%s660_s30] sm:$0xff] %v662_v20 }
 0x29f PF: > { %s392_s8 = sadd.s32 1, %s952_s8  }
 0x2a0   : > { %p389_p6 = scmp.ge.s32.totalorder %s392_s8, 2  }
 0x2a1   :  { %v768_v49 = vld [vmem:[%s1261_s11] ss:$0 sm:$0xff] (%p389_p6)  ;;  %s957_s15 = smov (%p389_p6), [#allocation7]  }
 0x2a2   :  { %391 = sbr.rel (!%p389_p6) target bundleno = 464 (0x1d0), region = 82  ;;  %v769_v52 = vld [vmem:[%s1262_s12] ss:$0 sm:$0xff] (%p389_p6)  ;;  %s735_s2 = sshll.u32 (%p389_p6), %s957_s15, 4  ;;  %s736_s2 = int_to_ptr.vmem [resolvable:$true] %s735_s2 }
 0x2a3   :  { %s920_s16 = scalar_lea.vmem (%p389_p6), %s736_s2, 256  ;;  %p925_p8 = scmp.lt.s32.totalorder (%p389_p6), %s736_s2, %s736_s2 }
 0x2a4   :  { %p921_p7 = scmp.ne.s32.totalorder (%p389_p6), %s736_s2, %s920_s16  ;;  %p926_p9 = scmp.lt.s32.totalorder (%p389_p6), %s920_s16, %s920_s16 }
 0x2a5   :  { %v667_v21 = vld [vmem:[#allocation7] sm:$0xff] (%p389_p6)  ;;  %v668_v22 = vld [vmem:[#allocation7 + $0x8] sm:$0xff] (%p389_p6) }
 0x2a6   :  { %vm669_vm8 = vcmp.eq.f32.partialorder (%p389_p6), %v667_v21, -inf  ;;  %vm670_vm9 = vcmp.eq.f32.partialorder (%p389_p6), %v668_v22, -inf  ;;  %p927_p10 = por (%p389_p6), %p926_p9, %p925_p8 }
 0x2a7   :  { %v671_v23 = vsel (%p389_p6), %vm669_vm8, 0.0, %v667_v21  ;;  %v672_v24 = vsel (%p389_p6), %vm670_vm9, 0.0, %v668_v22 }
 0x2a8   :  { %v680_v25 = vadd.f32 (%p389_p6), %v672_v24, %v671_v23  ;;  %p928_p11 = pnand (%p389_p6), %p927_p10, %p921_p7 }
 0x2aa   :  { %v681_v26 = vrot.slane %v680_v25, 4 }
 0x2ac   :  { %v682_v27 = vadd.f32 %v681_v26, %v680_v25 }
 0x2ae   :  { %v683_v28 = vrot.slane %v682_v27, 2 }
 0x2b0   :  { %v684_v29 = vadd.f32 %v683_v28, %v682_v27 }
 0x2b2   :  { %v685_v30 = vrot.slane %v684_v29, 1 }
 0x2b4   :  { %v686_v31 = vadd.f32 %v685_v30, %v684_v29 }
 0x2b6   :  { %v687_v32 = vmul.f32 0.0625, %v686_v31 }
 0x2b8   :  { %v688_v33 = vsub.f32 %v671_v23, %v687_v32  ;;  %v689_v34 = vsub.f32 %v672_v24, %v687_v32 }
 0x2ba   :  { %v692_v36 = vmul.f32 %v688_v33, %v688_v33  ;;  %v693_v37 = vmul.f32 %v689_v34, %v689_v34 }
 0x2bc   :  { %v694_v40 = vadd.f32 %v693_v37, %v692_v36 }
 0x2be   :  { %v695_v41 = vrot.slane %v694_v40, 4 }
 0x2c0   :  { %v696_v42 = vadd.f32 %v695_v41, %v694_v40 }
 0x2c2   :  { %v697_v43 = vrot.slane %v696_v42, 2 }
 0x2c4   :  { %v698_v44 = vadd.f32 %v697_v43, %v696_v42 }
 0x2c6   :  { %v699_v45 = vrot.slane %v698_v44, 1 }
 0x2c8   :  { %v700_v46 = vadd.f32 %v699_v45, %v698_v44 }
 0x2ca   :  { %v701_v47 = vmul.f32 0.0625, %v700_v46 }
 0x2cc   :  { %v702_v48 = vadd.f32 1e-05, %v701_v47 }
 0x2ce   :  { %906 = vrsqrt.f32 %v702_v48 }
 0x2d8   :  { %v907_v35 = vpop.eup %906 }
 0x2d9   :  { %v704_v50 = vmul.f32 %v907_v35, %v688_v33  ;;  %v705_v51 = vmul.f32 %v907_v35, %v689_v34 }
 0x2db   :  { %v713_v53 = vmul.f32 %v768_v49, %v704_v50  ;;  %v714_v38 = vmul.f32 %v768_v49, %v705_v51 }
 0x2dd   :  { %v722_v54 = vadd.f32 %v769_v52, %v713_v53  ;;  %v723_v55 = vadd.f32 %v769_v52, %v714_v38 }
 0x2df   :  { %v724_v56 = vmax.f32 %v722_v54, 0.0  ;;  %v725_v57 = vmax.f32 %v723_v55, 0.0 }
 0x2e1   :  { %728 = vst [vmem:[#allocation7] sm:$0xff] %v724_v56  ;;  %729 = vst [vmem:[#allocation7 + $0x8] sm:$0xff] %v725_v57 }
 0x2e2   :  { %931 = shalt.err (!%p928_p11)
}
 0x2e3   :  { %s932_s17 = scalar_lea.hbm %s1263_s13, 256 }
 0x2e4   :  { %p933_p12 = scmp.ne.s32.totalorder %s1263_s13, %s932_s17  ;;  %p936_p13 = scmp.lt.u32.totalorder %s932_s17, %s1263_s13 }
 0x2e6   :  { %p938_p0 = pnand %p936_p13, %p933_p12 }
 0x2e8   :  { %941 = shalt.err (!%p938_p0)
}
 0x2e9   :  { %s958_s21 = smov 128   ;;  %s959_s9 = smov 8  }
 0x2ea   :  { %741 = dma.vmem_to_hbm [thread:$0]  %s736_s2, 256, %s1263_s13, [#allocation8], %s958_s21, %s958_s21, %s959_s9  }
 0x2eb   :  { %948 = dma.done.wait [#allocation8], 256  }
 0x2ec   :  { %949 = vsyncadd [#allocation8], 4294967040 }
 0x2ed   :  { %745 = vsyncpa [#allocation8], 1 }

</bundles_post_ra>
